<compile_context>
chip_gen: v7x
topology: tpu7x:2x2x1
jax: 0.10.0
libtpu: 0.0.40
codegen_flags: <defaults>
</compile_context>

<pallas_src>
import math

import jax
import jax.numpy as jnp
from jax.experimental import pallas as pl
from jax.experimental.pallas import tpu as pltpu


def _eca_kernel(w_ref, x_ref, o_ref):
    # w_ref: (k,) f32 conv taps in SMEM.
    # x_ref / o_ref: (Bt, C, HW) VMEM blocks (Bt batches per grid step).
    x = x_ref[...]                                   # input dtype; no f32 slab copy
    Bt, C, HW = x.shape
    k = w_ref.shape[0]
    pad = (k - 1) // 2

    # Global average pool over the lane (H*W) axis, accumulated in f32.
    pooled = jnp.sum(x, axis=2, keepdims=True, dtype=jnp.float32) * (1.0 / HW)  # (Bt, C, 1)

    # Zero-padded 1-D cross-correlation along the channel (sublane) axis,
    # matching torch.nn.Conv1d(1, 1, k, padding=(k-1)//2, bias=False).
    if pad > 0:
        zeros = jnp.zeros((Bt, pad, 1), jnp.float32)
        padded = jnp.concatenate([zeros, pooled, zeros], axis=1)   # (Bt, C+2p, 1)
    else:
        padded = pooled
    conv = padded[:, 0:C, :] * w_ref[0]
    for j in range(1, k):                  # k is a tiny static constant (1 / 3 / 5)
        conv = conv + padded[:, j:j + C, :] * w_ref[j]

    gate = 1.0 / (1.0 + jnp.exp(-conv))                            # (Bt, C, 1) f32

    # Broadcast-multiply in the input dtype (no full-tile f32 intermediate).
    o_ref[...] = x * gate.astype(o_ref.dtype)


def _pick_batch_tile(B, per_batch_bytes, target_bytes=2 << 20):
    """Largest divisor Bt of B such that the block stays <= ~target_bytes while the
    grid keeps >= 2 steps when B >= 2 (so both v7x TensorCores get work)."""
    min_steps = 2 if B >= 2 else 1
    best = 1
    for bt in range(1, B + 1):
        if B % bt:
            continue
        if B // bt < min_steps:
            continue
        if bt * per_batch_bytes <= target_bytes:
            best = max(best, bt)
    return best


def eca_attention(x, w):
    """x: (B, C, H, W); w: (k,) Conv1d taps. Returns x * sigmoid(conv1d(GAP(x)))."""
    B, C, H, W = x.shape
    HW = H * W
    k = int(w.shape[0])
    itemsize = jnp.dtype(x.dtype).itemsize
    x2 = x.reshape(B, C, HW)                          # lane-dense last axis

    Bt = _pick_batch_tile(B, C * HW * itemsize)
    steps = B // Bt
    block_bytes = Bt * C * HW * itemsize
    # Double-buffered input + output blocks, plus headroom for tiny scratch.
    vmem_limit = int(min(64 << 20, max(16 << 20, 4 * block_bytes + (4 << 20))))

    w32 = w.astype(jnp.float32)

    out = pl.pallas_call(
        _eca_kernel,
        out_shape=jax.ShapeDtypeStruct((B, C, HW), x.dtype),
        grid_spec=pltpu.PrefetchScalarGridSpec(
            num_scalar_prefetch=0,
            grid=(steps,),
            in_specs=[
                pl.BlockSpec(memory_space=pltpu.MemorySpace.SMEM),      # conv taps
                pl.BlockSpec((Bt, C, HW), lambda b: (b, 0, 0)),         # x slab
            ],
            out_specs=pl.BlockSpec((Bt, C, HW), lambda b: (b, 0, 0)),
        ),
        compiler_params=pltpu.CompilerParams(
            dimension_semantics=("parallel",),        # batch blocks are independent
            vmem_limit_bytes=vmem_limit,
        ),
        cost_estimate=pl.CostEstimate(
            flops=3 * B * C * HW,
            transcendentals=B * C,
            bytes_accessed=2 * B * C * HW * itemsize + k * 4,
        ),
    )(w32, x2)
    return out.reshape(B, C, H, W)


def eca_ref(x, w):
    """Pure-JAX reference matching the PyTorch forward."""
    B, C, H, W = x.shape
    k = w.shape[0]
    pad = (k - 1) // 2
    pooled = jnp.mean(x.astype(jnp.float32), axis=(2, 3))           # (B, C)
    padded = jnp.pad(pooled, ((0, 0), (pad, pad)))
    conv = jnp.zeros((B, C), jnp.float32)
    for j in range(k):
        conv = conv + padded[:, j:j + C] * w[j]
    gate = 1.0 / (1.0 + jnp.exp(-conv))
    return (x.astype(jnp.float32) * gate[:, :, None, None]).astype(x.dtype)


def _eca_kernel_size(channel, gamma=2, b=1):
    t = int(abs((math.log(channel, 2) + b) / gamma))
    return t if t % 2 else t + 1


if __name__ == "__main__":
    key = jax.random.PRNGKey(0)
    kx, kw, kx2, kw2, kx3 = jax.random.split(key, 5)

    # Test 1: C=8 -> adaptive k_size = 3 (exercises channel conv + zero padding).
    B, C, H, W = 2, 8, 16, 16
    k = _eca_kernel_size(C)                                   # == 3
    x = jax.random.normal(kx, (B, C, H, W), dtype=jnp.float32)
    w = jax.random.normal(kw, (k,), dtype=jnp.float32) * 0.5

    out = jax.block_until_ready(eca_attention(x, w))
    ref = eca_ref(x, w)
    assert out.shape == ref.shape and out.dtype == ref.dtype
    assert jnp.allclose(out, ref, rtol=1e-5, atol=1e-5), float(
        jnp.max(jnp.abs(out - ref)))

    # Test 2: C=4 -> adaptive k_size = 1 (pad == 0 path).
    C2 = 4
    k2 = _eca_kernel_size(C2)                                 # == 1
    x2 = jax.random.normal(kx2, (B, C2, H, W), dtype=jnp.float32)
    w2 = jax.random.normal(kw2, (k2,), dtype=jnp.float32) * 0.5

    out2 = jax.block_until_ready(eca_attention(x2, w2))
    ref2 = eca_ref(x2, w2)
    assert jnp.allclose(out2, ref2, rtol=1e-5, atol=1e-5), float(
        jnp.max(jnp.abs(out2 - ref2)))

    # Test 3: larger batch -> Bt > 1 batches merged per grid step (grid still >= 2).
    B3 = 8
    x3 = jax.random.normal(kx3, (B3, C, H, W), dtype=jnp.float32)
    out3 = jax.block_until_ready(eca_attention(x3, w))
    ref3 = eca_ref(x3, w)
    assert jnp.allclose(out3, ref3, rtol=1e-5, atol=1e-5), float(
        jnp.max(jnp.abs(out3 - ref3)))

    print("KERNEL_OK")
</pallas_src>

<mosaic_0001>
module attributes {stable_mosaic.version = 11 : i64} {
  func.func @_eca_kernel(%arg0: i32, %arg1: memref<3xf32, #tpu.memory_space<smem>>, %arg2: memref<1x8x256xf32, #tpu.memory_space<vmem>>, %arg3: memref<1x8x256xf32, #tpu.memory_space<vmem>>) attributes {dimension_semantics = [#tpu.dimension_semantics<parallel>], iteration_bounds = array<i64: 2>, scalar_prefetch = 0 : i64, scratch_operands = 0 : i64, tpu.core_type = #tpu.core_type<tc>, window_params = [{transform_indices = @transform_0, window_bounds = array<i64: 3>}, {transform_indices = @transform_1, window_bounds = array<i64: 1, 8, 256>}, {transform_indices = @transform_2, window_bounds = array<i64: 1, 8, 256>}]} {
    %c0 = arith.constant 0 : index
    %c0_0 = arith.constant 0 : index
    %c0_1 = arith.constant 0 : index
    %0 = vector.load %arg2[%c0, %c0_0, %c0_1] : memref<1x8x256xf32, #tpu.memory_space<vmem>>, vector<1x8x256xf32>
    %cst = arith.constant dense<0.000000e+00> : vector<1x8xf32>
    %1 = vector.multi_reduction <add>, %0, %cst [2] : vector<1x8x256xf32> to vector<1x8xf32>
    %2 = vector.shape_cast %1 : vector<1x8xf32> to vector<1x8x1xf32>
    %cst_2 = arith.constant 3.906250e-03 : f32
    %3 = vector.broadcast %cst_2 : f32 to vector<1x8x1xf32>
    %4 = arith.mulf %2, %3 : vector<1x8x1xf32>
    %cst_3 = arith.constant 0.000000e+00 : f32
    %5 = vector.broadcast %cst_3 : f32 to vector<1x1x1xf32>
    %6 = tpu.concatenate %5, %4, %5 in 1 : vector<1x1x1xf32>, vector<1x8x1xf32>, vector<1x1x1xf32> -> vector<1x10x1xf32>
    %7 = vector.extract_strided_slice %6 {offsets = [0, 0, 0], sizes = [1, 8, 1], strides = [1, 1, 1]} : vector<1x10x1xf32> to vector<1x8x1xf32>
    %c0_4 = arith.constant 0 : index
    %8 = memref.load %arg1[%c0_4] : memref<3xf32, #tpu.memory_space<smem>>
    %9 = vector.broadcast %8 : f32 to vector<1x8x1xf32>
    %10 = arith.mulf %7, %9 : vector<1x8x1xf32>
    %11 = vector.extract_strided_slice %6 {offsets = [0, 1, 0], sizes = [1, 8, 1], strides = [1, 1, 1]} : vector<1x10x1xf32> to vector<1x8x1xf32>
    %c1 = arith.constant 1 : index
    %12 = memref.load %arg1[%c1] : memref<3xf32, #tpu.memory_space<smem>>
    %13 = vector.broadcast %12 : f32 to vector<1x8x1xf32>
    %14 = arith.mulf %11, %13 : vector<1x8x1xf32>
    %15 = arith.addf %10, %14 : vector<1x8x1xf32>
    %16 = vector.extract_strided_slice %6 {offsets = [0, 2, 0], sizes = [1, 8, 1], strides = [1, 1, 1]} : vector<1x10x1xf32> to vector<1x8x1xf32>
    %c2 = arith.constant 2 : index
    %17 = memref.load %arg1[%c2] : memref<3xf32, #tpu.memory_space<smem>>
    %18 = vector.broadcast %17 : f32 to vector<1x8x1xf32>
    %19 = arith.mulf %16, %18 : vector<1x8x1xf32>
    %20 = arith.addf %15, %19 : vector<1x8x1xf32>
    %cst_5 = arith.constant 0.000000e+00 : f32
    %21 = vector.broadcast %cst_5 : f32 to vector<1x8x1xf32>
    %22 = arith.subf %21, %20 : vector<1x8x1xf32>
    %23 = math.exp %22 : vector<1x8x1xf32>
    %cst_6 = arith.constant 1.000000e+00 : f32
    %24 = vector.broadcast %cst_6 : f32 to vector<1x8x1xf32>
    %25 = arith.addf %24, %23 : vector<1x8x1xf32>
    %cst_7 = arith.constant 1.000000e+00 : f32
    %26 = vector.broadcast %cst_7 : f32 to vector<1x8x1xf32>
    %27 = arith.divf %26, %25 : vector<1x8x1xf32>
    %28 = vector.broadcast %27 : vector<1x8x1xf32> to vector<1x8x256xf32>
    %29 = arith.mulf %0, %28 : vector<1x8x256xf32>
    %c0_8 = arith.constant 0 : index
    %c0_9 = arith.constant 0 : index
    %c0_10 = arith.constant 0 : index
    %30 = vector.load %arg3[%c0_8, %c0_9, %c0_10] : memref<1x8x256xf32, #tpu.memory_space<vmem>>, vector<1x8x256xf32>
    tpu.vector_store %arg3[%c0_8, %c0_9, %c0_10], %29 {strides = array<i32>} : memref<1x8x256xf32, #tpu.memory_space<vmem>>, vector<1x8x256xf32>,
    return
  }
  func.func @transform_0(%arg0: i32) -> i32 {
    %c0_i32 = arith.constant 0 : i32
    %c0_i32_0 = arith.constant 0 : i32
    return %c0_i32 : i32
  }
  func.func @transform_1(%arg0: i32) -> (i32, i32, i32) {
    %c0_i32 = arith.constant 0 : i32
    %c0_i32_0 = arith.constant 0 : i32
    %c0_i32_1 = arith.constant 0 : i32
    return %arg0, %c0_i32, %c0_i32_0 : i32, i32, i32
  }
  func.func @transform_2(%arg0: i32) -> (i32, i32, i32) {
    %c0_i32 = arith.constant 0 : i32
    %c0_i32_0 = arith.constant 0 : i32
    %c0_i32_1 = arith.constant 0 : i32
    return %arg0, %c0_i32, %c0_i32_0 : i32, i32, i32
  }
}

</mosaic_0001>

<bundles_post_ra>
// kernel: tpu_custom_call.1
= control target key start
LH: loop header
LB: loop body
LE: loop exit
PB: predicated region body
PF: predicated region fallthrough
CT: control target
= control target key end

     0   :  { %7 = vsyncpa [#allocation5], 0  ;;  %s749_s0 = inlined_call_operand.hbm [shape: f32[3], index: 0, kind: input, shape index: {}]   ;;  %s750_s1 = inlined_call_operand.hbm [shape: f32[2,8,256], index: 1, kind: input, shape index: {}]   ;;  %s751_s2 = inlined_call_operand.hbm [shape: f32[2,8,256], index: 2, kind: output, shape index: {}]  }
   0x1   :  { %8 = vsyncpa [#allocation3], 0 }
   0x2   :  { %10 = vsyncpa [#allocation3 + $0x1], 0 }
   0x3   :  { %11 = vsyncpa [#allocation4], 0 }
   0x4   :  { %13 = vsyncpa [#allocation4 + $0x1], 0  ;;  %s540_s9 = smov 0   ;;  %s542_s10 = smov 0  }
   0x5   :  { %s544_s11 = smov 0   ;;  %s546_s12 = smov 0  }
   0x6 LB: > { %s561_s13 = sadd.s32 4294967295, %s519_s12   ;;  %s323_s14 = sadd.s32 4294967294, %s519_s12   ;;  %s519_s12 = sphi %s546_s12, %s772_s12   ;;  %s515_s11 = sphi %s544_s11, %s771_s11   ;;  %s511_s10 = sphi %s542_s10, %s770_s10   ;;  %s507_s9 = sphi %s540_s9, %s769_s9  }
   0x7   : > { %p60_p0 = scmp.ne.s32.totalorder %s511_s10, %s507_s9  ;;  %p752_p1 = scmp.eq.s32.totalorder %s561_s13, 0 }
   0x8   : > { %p90_p3 = scmp.eq.s32.totalorder %s323_s14, 1  ;;  %p324_p5 = scmp.ge.s32.totalorder %s519_s12, 1 }
   0x9   : > { %p570_p4 = por %p752_p1, %p60_p0  ;;  %p97_p7 = scmp.lt.s32.totalorder %s519_s12, 3 }
   0xa   : > { %p575_p6 = por %p90_p3, %p60_p0  ;;  %s586_s18 = sadd.s32 1, %s519_s12  }
   0xb   : > { %s755_s15 = scalar_select %p570_p4, 1, 0 }
   0xc   : > { %s756_s16 = scalar_select %p575_p6, 1, 0 }
   0xd   : > { %p580_p8 = pnand %p324_p5, %p97_p7  ;;  %s44_s19 = ssub.s32 %s519_s12, %s586_s18 }
   0xe   : > { %s47_s20 = sadd.s32 1, %s515_s11  ;;  %p599_p12 = scmp.eq.s32.totalorder %s44_s19, 0 }
   0xf   : > { %p351_p10 = pneg %p580_p8  ;;  %p54_p13 = scmp.ne.s32.totalorder %s515_s11, %s511_s10 }
  0x10   : > { %p55_p0 = scmp.eq.s32.totalorder %s519_s12, 0  ;;  %p364_p3 = scmp.lt.s32.totalorder %s519_s12, 2 }
  0x11   : > { %p595_p11 = pnand %p351_p10, %p752_p1  ;;  %s406_s25 = scalar_lea.hbm %s749_s0, 16 }
  0x12   : > { %p407_p5 = scmp.ne.s32.totalorder %s749_s0, %s406_s25  ;;  %p413_p1 = scmp.lt.u32.totalorder %s406_s25, %s749_s0 }
  0x13   : > { %p408_p7 = pneg %p595_p11 }
  0x15   : > { %p409_p10 = pnand %p408_p7, %p407_p5 }
  0x17   : > { %p410_p9 = pneg %p409_p10 }
  0x19   : > { %p415_p2 = pnand %p413_p1, %p410_p9 }
  0x1b   : > { %418 = shalt.err (!%p415_p2)
}
  0x1c   : > { %s521_s30 = smov [#allocation2]   ;;  %p56_p1 = por %p55_p0, %p54_p13 }
  0x1d   : > { %354 = dma.hbm_to_smem (!%p595_p11), %s749_s0, 16, %s521_s30, [#allocation5]  }
  0x1e   : > { %s626_s5 = scalar_select %p599_p12, %s515_s11, %s47_s20  }
  0x1f   : > { %p760_p2 = scmp.eq.s32.totalorder %s561_s13, 1  ;;  %s119_s7 = sand.u32 1, %s515_s11  }
  0x20   : > { %s341_s8 = sshll.u32 %s519_s12, 8  ;;  %s327_s14 = sshll.u32 %s119_s7, 4 }
  0x21   : > { %p638_p9 = por %p760_p2, %p54_p13  ;;  %s647_s23 = scalar_lea.hbm %s750_s1, %s341_s8 }
  0x22   : > { %s123_s20 = scalar_lea.vmem [#allocation6], %s327_s14  ;;  %p651_p11 = pnand %p364_p3, %p56_p1 }
  0x23   : > { %s761_s6 = scalar_select %p638_p9, 1, 0 }
  0x24   : > { %s131_s22 = sshll.u32 %s123_s20, 4  ;;  %s120_s25 = scalar_lea.sflag [#allocation3], %s119_s7  ;;  %s655_s22 = int_to_ptr.vmem [resolvable:$true] %s131_s22 }
  0x25   : > { %s419_s26 = scalar_lea.hbm %s647_s23, 256  ;;  %p421_p13 = pneg %p651_p11 }
  0x26   : > { %p420_p12 = scmp.ne.s32.totalorder %s647_s23, %s419_s26  ;;  %s424_s29 = scalar_lea.hbm %s750_s1, 512 }
  0x27   : > { %p425_p3 = scmp.lt.u32.totalorder %s647_s23, %s750_s1  ;;  %p426_p7 = scmp.lt.u32.totalorder %s424_s29, %s419_s26 }
  0x28   : > { %p422_p0 = pnand %p421_p13, %p420_p12  ;;  %p428_p1 = scmp.lt.u32.totalorder %s419_s26, %s647_s23 }
  0x29   : > { %p427_p10 = por %p426_p7, %p425_p3 }
  0x2a   : > { %p423_p5 = pneg %p422_p0 }
  0x2b   : > { %p429_p2 = por %p428_p1, %p427_p10 }
  0x2d   : > { %p430_p6 = pnand %p429_p2, %p423_p5 }
  0x2f   : > { %433 = shalt.err (!%p430_p6)
}
  0x30   : > { %s434_s4 = scalar_lea.vmem %s655_s22, 256  ;;  %s522_s7 = smov [#allocation6]  }
  0x31   : > { %p435_p12 = scmp.ne.s32.totalorder %s655_s22, %s434_s4  ;;  %s439_s8 = sshll.u32 %s522_s7, 4  ;;  %s440_s8 = int_to_ptr.vmem [resolvable:$false] %s439_s8 }
  0x32   : > { %s441_s14 = scalar_lea.vmem %s440_s8, 512  ;;  %p442_p4 = scmp.lt.s32.totalorder %s655_s22, %s440_s8 }
  0x33   : > { %p437_p0 = pnand %p435_p12, %p421_p13  ;;  %p443_p3 = scmp.lt.s32.totalorder %s441_s14, %s434_s4 }
  0x35   : > { %p438_p9 = pneg %p437_p0  ;;  %p444_p7 = por %p443_p3, %p442_p4 }
  0x37   : > { %p445_p10 = pnand %p444_p7, %p438_p9 }
  0x39   : > { %448 = shalt.err (!%p445_p10)
}
  0x3a   : > { %358 = dma.hbm_to_vmem [thread:$0]  (!%p651_p11), %s647_s23, 256, %s655_s22, %s120_s25  }
  0x3b   : > { %140 = sbr.rel (%p580_p8) target bundleno = 404 (0x194), region = 28  ;;  %p763_p6 = scmp.eq.s32.totalorder (!%p580_p8), %s561_s13, 0 }
  0x42   : > { %494 = dma.done.wait (%p763_p6), [#allocation5], 16   ;;  %p764_p13 = pmov %p763_p6 }
  0x43   : > { %s689_s19 = sand.u32 1, %s511_s10   ;;  %p765_p4 = scmp.ne.s32.totalorder %s755_s15, 0 }
  0x44   : > { %496 = vsyncadd (%p764_p13), [#allocation5], 4294967280  ;;  %s332_s21 = sshll.u32 %s689_s19, 4  ;;  %s147_s20 = scalar_lea.sflag [#allocation3], %s689_s19 }
  0x45   : > { %s150_s23 = scalar_lea.vmem [#allocation6], %s332_s21 }
  0x46   : > { %498 = dma.done.wait (%p765_p4), %s147_s20, 256  }
  0x47   : > { %500 = vsyncadd (%p765_p4), %s147_s20, 4294967040 }
  0x48   : > { %155 = sfence }
  0x49   : > { %v172_v0 = vld [vmem:[%s150_s23] sm:$0xff]  ;;  %v173_v1 = vld [vmem:[%s150_s23 + $0x8] sm:$0xff]  ;;  %v523_v3 = vmov 0   ;;  %s334_s17 = sld [smem:[#allocation2 + $0x1]]  ;;  %s335_s22 = sld [smem:[#allocation2 + $0x2]]  ;;  %vm181_vm0 = vcmask 1040384  }
  0x4a   : > { %v174_v2 = vadd.f32 %v173_v1, %v172_v0  ;;  %401 = vset.pattern.permute.xlu0 %v523_v3  ;;  %s184_s24 = sld [smem:[#allocation2]]  ;;  %vm193_vm1 = vcmask 1046528   ;;  %vm205_vm2 = vcmask 1045504   ;;  %s342_s15 = sshll.u32 %s561_s13, 8 }
  0x4b   : > { %s171_s25 = scalar_lea.vmem [#allocation7], %s332_s21  ;;  %s705_s29 = scalar_lea.hbm %s751_s2, %s342_s15 }
  0x4c   : > { %175 = vadd.xlane.f32.xlu0 %v174_v2  ;;  %s241_s26 = sshll.u32 %s171_s25, 4  ;;  %s227_s30 = scalar_lea.sflag [#allocation4], %s689_s19  ;;  %s707_s26 = int_to_ptr.vmem [resolvable:$true] %s241_s26 }
  0x4d   : > { %s449_s13 = scalar_lea.vmem %s707_s26, 256  ;;  %p766_p9 = scmp.ne.s32.totalorder %s761_s6, 0 }
  0x4e   : > { %p450_p8 = scmp.ne.s32.totalorder %s707_s26, %s449_s13  ;;  %s524_s3 = smov [#allocation7]  }
  0x4f   : > { %v188_v6 = vstv %s334_s17  ;;  %v200_v7 = vstv %s335_s22  ;;  %s453_s4 = sshll.u32 %s524_s3, 4  ;;  %s454_s4 = int_to_ptr.vmem [resolvable:$false] %s453_s4 }
  0x50   : > { %v185_v11 = vstv %s184_s24  ;;  %p451_p11 = pnand %p450_p8, %p766_p9  ;;  %s455_s7 = scalar_lea.vmem %s454_s4, 512 }
  0x51   : > { %p456_p1 = scmp.lt.s32.totalorder %s707_s26, %s454_s4  ;;  %p457_p2 = scmp.lt.s32.totalorder %s455_s7, %s449_s13 }
  0x52   : > { %p452_p5 = pneg %p451_p11 }
  0x53   : > { %p458_p12 = por %p457_p2, %p456_p1 }
  0x55   : > { %p459_p0 = pnand %p458_p12, %p452_p5 }
  0xd9   : > { %v176_v4 = vpop.xlane.xlu0 %175 }
  0xda   : > { %v177_v5 = vmul.f32 0.00390625, %v176_v4 }
  0xdc   : > { %v179_v8 = vrot.slane %v177_v5, 7 }
  0xde   : > { %v182_v9 = vsel %vm181_vm0, 0.0, %v179_v8  ;;  %v183_v10 = vsel %vm181_vm0, %v179_v8, 0.0 }
  0xdf   : > { %v189_v12 = vmul.f32 %v188_v6, %v182_v9  ;;  %v190_v13 = vmul.f32 %v188_v6, %v183_v10  ;;  %v201_v14 = vmul.f32 %v200_v7, %v182_v9  ;;  %v202_v15 = vmul.f32 %v200_v7, %v183_v10 }
  0xe0   : > { %v186_v19 = vmul.f32 %v185_v11, %v182_v9 }
  0xe1   : > { %v194_v16 = vrot.slane %v189_v12, 1  ;;  %v195_v17 = vrot.slane %v190_v13, 1  ;;  %v206_v18 = vrot.slane %v201_v14, 2  ;;  %v207_v20 = vrot.slane %v202_v15, 2 }
  0xe3   : > { %v196_v21 = vsel %vm193_vm1, %v194_v16, %v195_v17  ;;  %v208_v23 = vsel %vm205_vm2, %v206_v18, %v207_v20 }
  0xe4   : > { %v198_v22 = vadd.f32 %v196_v21, %v186_v19 }
  0xe6   : > { %v210_v24 = vadd.f32 %v208_v23, %v198_v22 }
  0xe8   : > { %v211_v25 = vsub.f32 0.0, %v210_v24 }
  0xea   : > { %v212_v26 = vmul.f32 1.442695, %v211_v25 }
  0xec   : > { %402 = vpow2.f32 %v212_v26 }
  0xf6   : > { %v403_v27 = vpop.eup %402 }
  0xf7   : > { %v214_v28 = vadd.f32 1.0, %v403_v27 }
  0xf9   : > { %404 = vrcp.f32 %v214_v28 }
 0x103   : > { %v405_v29 = vpop.eup %404 }
 0x104   : > { %219 = vperm.xlu0 %401, %v405_v29  }
 0x183   : > { %v220_v30 = vpop.permute.xlu0 %219 }
 0x184   : > { %v222_v31 = vmul.f32 %v220_v30, %v172_v0  ;;  %v223_v32 = vmul.f32 %v220_v30, %v173_v1 }
 0x186   : > { %224 = vst [vmem:[%s171_s25] sm:$0xff] %v222_v31  ;;  %225 = vst [vmem:[%s171_s25 + $0x8] sm:$0xff] %v223_v32 }
 0x187   : > { %462 = shalt.err (!%p459_p0)
}
 0x188   : > { %s463_s8 = scalar_lea.hbm %s705_s29, 256  ;;  %s467_s21 = scalar_lea.hbm %s751_s2, 512 }
 0x189   : > { %p464_p3 = scmp.ne.s32.totalorder %s705_s29, %s463_s8  ;;  %p468_p6 = scmp.lt.u32.totalorder %s705_s29, %s751_s2 }
 0x18a   : > { %p469_p13 = scmp.lt.u32.totalorder %s467_s21, %s463_s8  ;;  %p471_p8 = scmp.lt.u32.totalorder %s463_s8, %s705_s29 }
 0x18b   : > { %p465_p7 = pnand %p464_p3, %p766_p9 }
 0x18c   : > { %p470_p4 = por %p469_p13, %p468_p6 }
 0x18d   : > { %p466_p10 = pneg %p465_p7 }
 0x18e   : > { %p472_p11 = por %p471_p8, %p470_p4 }
 0x190   : > { %p473_p5 = pnand %p472_p11, %p466_p10 }
 0x192   : > { %476 = shalt.err (!%p473_p5)
}
 0x193   : > { %349 = dma.vmem_to_hbm [thread:$0]  (%p766_p9), %s707_s26, 256, %s705_s29, %s227_s30  }
 0x194 PF: > { %s253_s17 = sand.u32 1, %s507_s9   ;;  %p767_p1 = scmp.ne.s32.totalorder %s756_s16, 0 }
 0x195   : > { %p768_p2 = scmp.ge.s32.totalorder %s519_s12, 2  ;;  %s254_s22 = scalar_lea.sflag [#allocation4], %s253_s17 }
 0x197   : > { %p360_p12 = pnand %p768_p2, %p767_p1 }
 0x199   : > { %502 = dma.done.wait (!%p360_p12), %s254_s22, 256  }
 0x19a   : > { %504 = vsyncadd (!%p360_p12), %s254_s22, 4294967040  ;;  %p16_p0 = scmp.ge.s32.totalorder %s586_s18, 4   ;;  %s769_s9 = smov %s511_s10 }
 0x19b   : > { %s770_s10 = smov %s515_s11  ;;  %s771_s11 = smov %s626_s5 }
 0x19c   : > { %s772_s12 = smov %s586_s18  ;;  %18 = sbr.rel (!%p16_p0) target bundleno = 6 (0x6), region = 78 }
 0x1a3   :  { %259 = vsyncpa [#allocation3], 1 }
 0x1a4   :  { %261 = vsyncpa [#allocation3 + $0x1], 1 }
 0x1a5   :  { %262 = vsyncpa [#allocation4], 1 }
 0x1a6   :  { %264 = vsyncpa [#allocation4 + $0x1], 1 }
 0x1a7   :  { %265 = vsyncpa [#allocation5], 1 }
 0x1a8   :  { %267 = vsyncpa [#allocation5 + $0x1], 1 }

</bundles_post_ra>
